<compile_context>
chip_gen: v7x
topology: tpu7x:2x2x1
jax: 0.10.0
libtpu: 0.0.40
codegen_flags: <defaults>
</compile_context>

<pallas_src>
import math

import jax
import jax.numpy as jnp
from jax.experimental import pallas as pl
from jax.experimental.pallas import tpu as pltpu

REP = 416      # the torch graph collapses to 416 lane-wise copies of gelu^6(x1)
N_GELU = 6     # depth of the nested gelu chain
_INV_SQRT2 = 1.0 / math.sqrt(2.0)


def _gelu_exact(x):
    # Matches torch.nn.functional.gelu default (exact erf formulation).
    return 0.5 * x * (1.0 + jax.lax.erf(x * _INV_SQRT2))


def _select_tiling(R, D, itemsize):
    """Pick (tile_r, unit_reps, unit_w, copies_per_chunk, chunk_w)."""
    # Row tile: whole array if small, else 256 rows (multiple of 8; partial
    # trailing tiles are handled by Pallas).
    tile_r = R if R <= 256 else 256

    # Replication unit: smallest number of gelu^6(x1) copies whose width is a
    # multiple of 128 lanes -> lane-dense, unmasked stores.
    g = math.gcd(D, 128)
    unit_reps = 128 // g
    if unit_reps > REP or REP % unit_reps != 0:
        # Lane alignment impossible (D not a multiple of 4): fall back to the
        # largest divisor of REP that keeps the unit modest (<= ~512 lanes).
        unit_reps = max(r for r in range(1, REP + 1)
                        if REP % r == 0 and r * D <= max(D, 512))
    unit_w = unit_reps * D

    # Output chunk: several units, targeting ~16 KiB of output per row
    # (~4096 f32 lanes) so writeback DMAs are large and well pipelined while
    # the double-buffered chunk stays far below v7x's 64 MiB VMEM.
    total_units = REP // unit_reps
    target_w = max(unit_w, (4096 * 4) // itemsize)
    copies = max(1, min(total_units, target_w // unit_w))
    while total_units % copies != 0:   # make chunks tile the output exactly
        copies -= 1
    chunk_w = copies * unit_w
    return tile_r, unit_reps, unit_w, copies, chunk_w


def _make_kernel(unit_reps, unit_w, copies):
    def kernel(x_ref, o_ref, unit_ref):
        # Compute gelu^6 once per row tile (the rep-chunk axis is innermost,
        # so the scratch stays valid for all chunks of this row tile).
        @pl.when(pl.program_id(1) == 0)
        def _fill_unit():
            g = x_ref[...].astype(jnp.float32)
            for _ in range(N_GELU):          # unrolled elementwise VPU/EUP chain
                g = _gelu_exact(g)
            unit_ref[...] = jnp.tile(g, (1, unit_reps)).astype(unit_ref.dtype)

        # Stream the lane-dense replication unit into this output chunk.
        unit = unit_ref[...]
        for c in range(copies):              # static offsets -> unmasked stores
            o_ref[:, pl.ds(c * unit_w, unit_w)] = unit

    return kernel


def model_forward(x1):
    """x1: (B, S, D) -> (B, S, 416 * D), matching the torch Model.forward."""
    B, S, D = x1.shape
    R = B * S
    OUT = REP * D
    itemsize = jnp.dtype(x1.dtype).itemsize

    tile_r, unit_reps, unit_w, copies, chunk_w = _select_tiling(R, D, itemsize)
    grid = (pl.cdiv(R, tile_r), pl.cdiv(OUT, chunk_w))

    # VMEM budget: double-buffered input tile + pipelined output chunks +
    # the replication-unit scratch (plus margin), capped safely below v7x VMEM.
    vmem_need = (2 * tile_r * D * itemsize
                 + 3 * tile_r * chunk_w * itemsize
                 + tile_r * unit_w * itemsize)
    vmem_limit = int(min(48 * 1024 * 1024,
                         max(32 * 1024 * 1024, 2 * vmem_need)))

    x2d = x1.reshape(R, D)
    out2d = pl.pallas_call(
        _make_kernel(unit_reps, unit_w, copies),
        out_shape=jax.ShapeDtypeStruct((R, OUT), x1.dtype),
        grid=grid,
        in_specs=[pl.BlockSpec((tile_r, D), lambda i, j: (i, 0))],
        out_specs=pl.BlockSpec((tile_r, chunk_w), lambda i, j: (i, j)),
        scratch_shapes=[pltpu.VMEM((tile_r, unit_w), x1.dtype)],
        compiler_params=pltpu.CompilerParams(
            dimension_semantics=("parallel", "arbitrary"),
            vmem_limit_bytes=vmem_limit),
    )(x2d)
    return out2d.reshape(B, S, OUT)


def _reference(x1):
    """Plain-JAX transliteration of the torch forward (for verification)."""
    gelu = lambda x: 0.5 * x * (1.0 + jax.lax.erf(x / math.sqrt(2.0)))
    cat = lambda a, b: jnp.concatenate([a, b], axis=-1)
    x2 = cat(gelu(x1), gelu(x1))
    x3 = cat(gelu(x2), gelu(x2))
    x4 = cat(gelu(x3), gelu(x3))
    x5 = cat(gelu(x4), gelu(x4))
    x6 = cat(gelu(x5), gelu(x5))
    x7 = cat(x6, gelu(x5))
    x8 = cat(x7, gelu(x5))
    x9 = cat(x8, gelu(x5))
    x10 = cat(x9, gelu(x5))
    x11 = cat(x10, gelu(x5))
    x12 = cat(x11, gelu(x5))
    x13 = cat(x12, gelu(x5))
    x14 = cat(x13, gelu(x5))
    x15 = cat(x14, gelu(x5))
    x16 = cat(x15, gelu(x5))
    x17 = cat(x16, gelu(x5))
    x18 = cat(gelu(x17), gelu(x17))
    return x18


if __name__ == "__main__":
    key = jax.random.PRNGKey(0)
    # small (batch, seq, hidden) consistent with the module's 3-D input
    x1 = jax.random.normal(key, (2, 8, 32), dtype=jnp.float32)

    out = jax.block_until_ready(model_forward(x1))

    ref = _reference(x1)
    assert out.shape == ref.shape == (2, 8, REP * 32), (out.shape, ref.shape)
    assert jnp.allclose(out, ref, atol=1e-5, rtol=1e-5), float(
        jnp.max(jnp.abs(out - ref)))

    print("KERNEL_OK")
</pallas_src>

<mosaic_0001>
module attributes {stable_mosaic.version = 11 : i64} {
  func.func @kernel(%arg0: i32, %arg1: i32, %arg2: memref<16x32xf32, #tpu.memory_space<vmem>>, %arg3: memref<16x3328xf32, #tpu.memory_space<vmem>>, %arg4: memref<16x128xf32, #tpu.memory_space<vmem>>) attributes {dimension_semantics = [#tpu.dimension_semantics<parallel>, #tpu.dimension_semantics<arbitrary>], iteration_bounds = array<i64: 1, 4>, scalar_prefetch = 0 : i64, scratch_operands = 1 : i64, tpu.core_type = #tpu.core_type<tc>, window_params = [{transform_indices = @transform_0, window_bounds = array<i64: 16, 32>}, {transform_indices = @transform_1, window_bounds = array<i64: 16, 3328>}]} {
    %c0_i32 = arith.constant 0 : i32
    %0 = arith.cmpi eq, %arg1, %c0_i32 : i32
    %1 = arith.extui %0 : i1 to i32
    %c0_i32_0 = arith.constant 0 : i32
    %2 = arith.cmpi ne, %1, %c0_i32_0 : i32
    scf.if %2 {
      %c0_29 = arith.constant 0 : index
      %c0_30 = arith.constant 0 : index
      %30 = vector.load %arg2[%c0_29, %c0_30] : memref<16x32xf32, #tpu.memory_space<vmem>>, vector<16x32xf32>
      %cst = arith.constant 5.000000e-01 : f32
      %31 = vector.broadcast %cst : f32 to vector<16x32xf32>
      %32 = arith.mulf %31, %30 : vector<16x32xf32>
      %cst_31 = arith.constant 0.707106769 : f32
      %33 = vector.broadcast %cst_31 : f32 to vector<16x32xf32>
      %34 = arith.mulf %30, %33 : vector<16x32xf32>
      %35 = math.erf %34 : vector<16x32xf32>
      %cst_32 = arith.constant 1.000000e+00 : f32
      %36 = vector.broadcast %cst_32 : f32 to vector<16x32xf32>
      %37 = arith.addf %36, %35 : vector<16x32xf32>
      %38 = arith.mulf %32, %37 : vector<16x32xf32>
      %cst_33 = arith.constant 5.000000e-01 : f32
      %39 = vector.broadcast %cst_33 : f32 to vector<16x32xf32>
      %40 = arith.mulf %39, %38 : vector<16x32xf32>
      %cst_34 = arith.constant 0.707106769 : f32
      %41 = vector.broadcast %cst_34 : f32 to vector<16x32xf32>
      %42 = arith.mulf %38, %41 : vector<16x32xf32>
      %43 = math.erf %42 : vector<16x32xf32>
      %cst_35 = arith.constant 1.000000e+00 : f32
      %44 = vector.broadcast %cst_35 : f32 to vector<16x32xf32>
      %45 = arith.addf %44, %43 : vector<16x32xf32>
      %46 = arith.mulf %40, %45 : vector<16x32xf32>
      %cst_36 = arith.constant 5.000000e-01 : f32
      %47 = vector.broadcast %cst_36 : f32 to vector<16x32xf32>
      %48 = arith.mulf %47, %46 : vector<16x32xf32>
      %cst_37 = arith.constant 0.707106769 : f32
      %49 = vector.broadcast %cst_37 : f32 to vector<16x32xf32>
      %50 = arith.mulf %46, %49 : vector<16x32xf32>
      %51 = math.erf %50 : vector<16x32xf32>
      %cst_38 = arith.constant 1.000000e+00 : f32
      %52 = vector.broadcast %cst_38 : f32 to vector<16x32xf32>
      %53 = arith.addf %52, %51 : vector<16x32xf32>
      %54 = arith.mulf %48, %53 : vector<16x32xf32>
      %cst_39 = arith.constant 5.000000e-01 : f32
      %55 = vector.broadcast %cst_39 : f32 to vector<16x32xf32>
      %56 = arith.mulf %55, %54 : vector<16x32xf32>
      %cst_40 = arith.constant 0.707106769 : f32
      %57 = vector.broadcast %cst_40 : f32 to vector<16x32xf32>
      %58 = arith.mulf %54, %57 : vector<16x32xf32>
      %59 = math.erf %58 : vector<16x32xf32>
      %cst_41 = arith.constant 1.000000e+00 : f32
      %60 = vector.broadcast %cst_41 : f32 to vector<16x32xf32>
      %61 = arith.addf %60, %59 : vector<16x32xf32>
      %62 = arith.mulf %56, %61 : vector<16x32xf32>
      %cst_42 = arith.constant 5.000000e-01 : f32
      %63 = vector.broadcast %cst_42 : f32 to vector<16x32xf32>
      %64 = arith.mulf %63, %62 : vector<16x32xf32>
      %cst_43 = arith.constant 0.707106769 : f32
      %65 = vector.broadcast %cst_43 : f32 to vector<16x32xf32>
      %66 = arith.mulf %62, %65 : vector<16x32xf32>
      %67 = math.erf %66 : vector<16x32xf32>
      %cst_44 = arith.constant 1.000000e+00 : f32
      %68 = vector.broadcast %cst_44 : f32 to vector<16x32xf32>
      %69 = arith.addf %68, %67 : vector<16x32xf32>
      %70 = arith.mulf %64, %69 : vector<16x32xf32>
      %cst_45 = arith.constant 5.000000e-01 : f32
      %71 = vector.broadcast %cst_45 : f32 to vector<16x32xf32>
      %72 = arith.mulf %71, %70 : vector<16x32xf32>
      %cst_46 = arith.constant 0.707106769 : f32
      %73 = vector.broadcast %cst_46 : f32 to vector<16x32xf32>
      %74 = arith.mulf %70, %73 : vector<16x32xf32>
      %75 = math.erf %74 : vector<16x32xf32>
      %cst_47 = arith.constant 1.000000e+00 : f32
      %76 = vector.broadcast %cst_47 : f32 to vector<16x32xf32>
      %77 = arith.addf %76, %75 : vector<16x32xf32>
      %78 = arith.mulf %72, %77 : vector<16x32xf32>
      %79 = tpu.concatenate %78, %78, %78, %78 in 1 : vector<16x32xf32>, vector<16x32xf32>, vector<16x32xf32>, vector<16x32xf32> -> vector<16x128xf32>
      %c0_48 = arith.constant 0 : index
      %c0_49 = arith.constant 0 : index
      %80 = vector.load %arg4[%c0_48, %c0_49] : memref<16x128xf32, #tpu.memory_space<vmem>>, vector<16x128xf32>
      tpu.vector_store %arg4[%c0_48, %c0_49], %79 {strides = array<i32>} : memref<16x128xf32, #tpu.memory_space<vmem>>, vector<16x128xf32>,
    } else {
    }
    %c0 = arith.constant 0 : index
    %c0_1 = arith.constant 0 : index
    %3 = vector.load %arg4[%c0, %c0_1] : memref<16x128xf32, #tpu.memory_space<vmem>>, vector<16x128xf32>
    %c0_2 = arith.constant 0 : index
    %c0_3 = arith.constant 0 : index
    %4 = vector.load %arg3[%c0_2, %c0_3] : memref<16x3328xf32, #tpu.memory_space<vmem>>, vector<16x128xf32>
    tpu.vector_store %arg3[%c0_2, %c0_3], %3 {strides = array<i32>} : memref<16x3328xf32, #tpu.memory_space<vmem>>, vector<16x128xf32>,
    %c0_4 = arith.constant 0 : index
    %c128 = arith.constant 128 : index
    %5 = vector.load %arg3[%c0_4, %c128] : memref<16x3328xf32, #tpu.memory_space<vmem>>, vector<16x128xf32>
    tpu.vector_store %arg3[%c0_4, %c128], %3 {strides = array<i32>} : memref<16x3328xf32, #tpu.memory_space<vmem>>, vector<16x128xf32>,
    %c0_5 = arith.constant 0 : index
    %c256 = arith.constant 256 : index
    %6 = vector.load %arg3[%c0_5, %c256] : memref<16x3328xf32, #tpu.memory_space<vmem>>, vector<16x128xf32>
    tpu.vector_store %arg3[%c0_5, %c256], %3 {strides = array<i32>} : memref<16x3328xf32, #tpu.memory_space<vmem>>, vector<16x128xf32>,
    %c0_6 = arith.constant 0 : index
    %c384 = arith.constant 384 : index
    %7 = vector.load %arg3[%c0_6, %c384] : memref<16x3328xf32, #tpu.memory_space<vmem>>, vector<16x128xf32>
    tpu.vector_store %arg3[%c0_6, %c384], %3 {strides = array<i32>} : memref<16x3328xf32, #tpu.memory_space<vmem>>, vector<16x128xf32>,
    %c0_7 = arith.constant 0 : index
    %c512 = arith.constant 512 : index
    %8 = vector.load %arg3[%c0_7, %c512] : memref<16x3328xf32, #tpu.memory_space<vmem>>, vector<16x128xf32>
    tpu.vector_store %arg3[%c0_7, %c512], %3 {strides = array<i32>} : memref<16x3328xf32, #tpu.memory_space<vmem>>, vector<16x128xf32>,
    %c0_8 = arith.constant 0 : index
    %c640 = arith.constant 640 : index
    %9 = vector.load %arg3[%c0_8, %c640] : memref<16x3328xf32, #tpu.memory_space<vmem>>, vector<16x128xf32>
    tpu.vector_store %arg3[%c0_8, %c640], %3 {strides = array<i32>} : memref<16x3328xf32, #tpu.memory_space<vmem>>, vector<16x128xf32>,
    %c0_9 = arith.constant 0 : index
    %c768 = arith.constant 768 : index
    %10 = vector.load %arg3[%c0_9, %c768] : memref<16x3328xf32, #tpu.memory_space<vmem>>, vector<16x128xf32>
    tpu.vector_store %arg3[%c0_9, %c768], %3 {strides = array<i32>} : memref<16x3328xf32, #tpu.memory_space<vmem>>, vector<16x128xf32>,
    %c0_10 = arith.constant 0 : index
    %c896 = arith.constant 896 : index
    %11 = vector.load %arg3[%c0_10, %c896] : memref<16x3328xf32, #tpu.memory_space<vmem>>, vector<16x128xf32>
    tpu.vector_store %arg3[%c0_10, %c896], %3 {strides = array<i32>} : memref<16x3328xf32, #tpu.memory_space<vmem>>, vector<16x128xf32>,
    %c0_11 = arith.constant 0 : index
    %c1024 = arith.constant 1024 : index
    %12 = vector.load %arg3[%c0_11, %c1024] : memref<16x3328xf32, #tpu.memory_space<vmem>>, vector<16x128xf32>
    tpu.vector_store %arg3[%c0_11, %c1024], %3 {strides = array<i32>} : memref<16x3328xf32, #tpu.memory_space<vmem>>, vector<16x128xf32>,
    %c0_12 = arith.constant 0 : index
    %c1152 = arith.constant 1152 : index
    %13 = vector.load %arg3[%c0_12, %c1152] : memref<16x3328xf32, #tpu.memory_space<vmem>>, vector<16x128xf32>
    tpu.vector_store %arg3[%c0_12, %c1152], %3 {strides = array<i32>} : memref<16x3328xf32, #tpu.memory_space<vmem>>, vector<16x128xf32>,
    %c0_13 = arith.constant 0 : index
    %c1280 = arith.constant 1280 : index
    %14 = vector.load %arg3[%c0_13, %c1280] : memref<16x3328xf32, #tpu.memory_space<vmem>>, vector<16x128xf32>
    tpu.vector_store %arg3[%c0_13, %c1280], %3 {strides = array<i32>} : memref<16x3328xf32, #tpu.memory_space<vmem>>, vector<16x128xf32>,
    %c0_14 = arith.constant 0 : index
    %c1408 = arith.constant 1408 : index
    %15 = vector.load %arg3[%c0_14, %c1408] : memref<16x3328xf32, #tpu.memory_space<vmem>>, vector<16x128xf32>
    tpu.vector_store %arg3[%c0_14, %c1408], %3 {strides = array<i32>} : memref<16x3328xf32, #tpu.memory_space<vmem>>, vector<16x128xf32>,
    %c0_15 = arith.constant 0 : index
    %c1536 = arith.constant 1536 : index
    %16 = vector.load %arg3[%c0_15, %c1536] : memref<16x3328xf32, #tpu.memory_space<vmem>>, vector<16x128xf32>
    tpu.vector_store %arg3[%c0_15, %c1536], %3 {strides = array<i32>} : memref<16x3328xf32, #tpu.memory_space<vmem>>, vector<16x128xf32>,
    %c0_16 = arith.constant 0 : index
    %c1664 = arith.constant 1664 : index
    %17 = vector.load %arg3[%c0_16, %c1664] : memref<16x3328xf32, #tpu.memory_space<vmem>>, vector<16x128xf32>
    tpu.vector_store %arg3[%c0_16, %c1664], %3 {strides = array<i32>} : memref<16x3328xf32, #tpu.memory_space<vmem>>, vector<16x128xf32>,
    %c0_17 = arith.constant 0 : index
    %c1792 = arith.constant 1792 : index
    %18 = vector.load %arg3[%c0_17, %c1792] : memref<16x3328xf32, #tpu.memory_space<vmem>>, vector<16x128xf32>
    tpu.vector_store %arg3[%c0_17, %c1792], %3 {strides = array<i32>} : memref<16x3328xf32, #tpu.memory_space<vmem>>, vector<16x128xf32>,
    %c0_18 = arith.constant 0 : index
    %c1920 = arith.constant 1920 : index
    %19 = vector.load %arg3[%c0_18, %c1920] : memref<16x3328xf32, #tpu.memory_space<vmem>>, vector<16x128xf32>
    tpu.vector_store %arg3[%c0_18, %c1920], %3 {strides = array<i32>} : memref<16x3328xf32, #tpu.memory_space<vmem>>, vector<16x128xf32>,
    %c0_19 = arith.constant 0 : index
    %c2048 = arith.constant 2048 : index
    %20 = vector.load %arg3[%c0_19, %c2048] : memref<16x3328xf32, #tpu.memory_space<vmem>>, vector<16x128xf32>
    tpu.vector_store %arg3[%c0_19, %c2048], %3 {strides = array<i32>} : memref<16x3328xf32, #tpu.memory_space<vmem>>, vector<16x128xf32>,
    %c0_20 = arith.constant 0 : index
    %c2176 = arith.constant 2176 : index
    %21 = vector.load %arg3[%c0_20, %c2176] : memref<16x3328xf32, #tpu.memory_space<vmem>>, vector<16x128xf32>
    tpu.vector_store %arg3[%c0_20, %c2176], %3 {strides = array<i32>} : memref<16x3328xf32, #tpu.memory_space<vmem>>, vector<16x128xf32>,
    %c0_21 = arith.constant 0 : index
    %c2304 = arith.constant 2304 : index
    %22 = vector.load %arg3[%c0_21, %c2304] : memref<16x3328xf32, #tpu.memory_space<vmem>>, vector<16x128xf32>
    tpu.vector_store %arg3[%c0_21, %c2304], %3 {strides = array<i32>} : memref<16x3328xf32, #tpu.memory_space<vmem>>, vector<16x128xf32>,
    %c0_22 = arith.constant 0 : index
    %c2432 = arith.constant 2432 : index
    %23 = vector.load %arg3[%c0_22, %c2432] : memref<16x3328xf32, #tpu.memory_space<vmem>>, vector<16x128xf32>
    tpu.vector_store %arg3[%c0_22, %c2432], %3 {strides = array<i32>} : memref<16x3328xf32, #tpu.memory_space<vmem>>, vector<16x128xf32>,
    %c0_23 = arith.constant 0 : index
    %c2560 = arith.constant 2560 : index
    %24 = vector.load %arg3[%c0_23, %c2560] : memref<16x3328xf32, #tpu.memory_space<vmem>>, vector<16x128xf32>
    tpu.vector_store %arg3[%c0_23, %c2560], %3 {strides = array<i32>} : memref<16x3328xf32, #tpu.memory_space<vmem>>, vector<16x128xf32>,
    %c0_24 = arith.constant 0 : index
    %c2688 = arith.constant 2688 : index
    %25 = vector.load %arg3[%c0_24, %c2688] : memref<16x3328xf32, #tpu.memory_space<vmem>>, vector<16x128xf32>
    tpu.vector_store %arg3[%c0_24, %c2688], %3 {strides = array<i32>} : memref<16x3328xf32, #tpu.memory_space<vmem>>, vector<16x128xf32>,
    %c0_25 = arith.constant 0 : index
    %c2816 = arith.constant 2816 : index
    %26 = vector.load %arg3[%c0_25, %c2816] : memref<16x3328xf32, #tpu.memory_space<vmem>>, vector<16x128xf32>
    tpu.vector_store %arg3[%c0_25, %c2816], %3 {strides = array<i32>} : memref<16x3328xf32, #tpu.memory_space<vmem>>, vector<16x128xf32>,
    %c0_26 = arith.constant 0 : index
    %c2944 = arith.constant 2944 : index
    %27 = vector.load %arg3[%c0_26, %c2944] : memref<16x3328xf32, #tpu.memory_space<vmem>>, vector<16x128xf32>
    tpu.vector_store %arg3[%c0_26, %c2944], %3 {strides = array<i32>} : memref<16x3328xf32, #tpu.memory_space<vmem>>, vector<16x128xf32>,
    %c0_27 = arith.constant 0 : index
    %c3072 = arith.constant 3072 : index
    %28 = vector.load %arg3[%c0_27, %c3072] : memref<16x3328xf32, #tpu.memory_space<vmem>>, vector<16x128xf32>
    tpu.vector_store %arg3[%c0_27, %c3072], %3 {strides = array<i32>} : memref<16x3328xf32, #tpu.memory_space<vmem>>, vector<16x128xf32>,
    %c0_28 = arith.constant 0 : index
    %c3200 = arith.constant 3200 : index
    %29 = vector.load %arg3[%c0_28, %c3200] : memref<16x3328xf32, #tpu.memory_space<vmem>>, vector<16x128xf32>
    tpu.vector_store %arg3[%c0_28, %c3200], %3 {strides = array<i32>} : memref<16x3328xf32, #tpu.memory_space<vmem>>, vector<16x128xf32>,
    return
  }
  func.func @transform_0(%arg0: i32, %arg1: i32) -> (i32, i32) {
    %c0_i32 = arith.constant 0 : i32
    %c0_i32_0 = arith.constant 0 : i32
    return %arg0, %c0_i32 : i32, i32
  }
  func.func @transform_1(%arg0: i32, %arg1: i32) -> (i32, i32) {
    %c0_i32 = arith.constant 0 : i32
    return %arg0, %arg1 : i32, i32
  }
}

</mosaic_0001>

<bundles_post_ra>
// kernel: tpu_custom_call.1
= control target key start
LH: loop header
LB: loop body
LE: loop exit
PB: predicated region body
PF: predicated region fallthrough
CT: control target
= control target key end

     0   :  { %6 = vsyncpa [#allocation4], 0  ;;  %s830_s0 = inlined_call_operand.hbm [shape: f32[16,32], index: 0, kind: input, shape index: {}]   ;;  %s831_s1 = inlined_call_operand.hbm [shape: f32[16,13312], index: 1, kind: output, shape index: {}]  }
   0x1   :  { %7 = vsyncpa [#allocation5], 0 }
   0x2   :  { %9 = vsyncpa [#allocation5 + $0x1], 0  ;;  %s620_s6 = smov 0   ;;  %s622_s7 = smov 0  }
   0x3   :  { %s624_s8 = smov 0   ;;  %s626_s9 = smov 0  }
   0x4   :  { %s628_s10 = smov 0   ;;  %s630_s11 = smov 0  }
   0x5 LB: > { %s378_s12 = sadd.s32 4294967295, %s598_s11   ;;  %s379_s13 = sadd.s32 4294967294, %s598_s11   ;;  %s598_s11 = sphi %s630_s11, %s15_s11   ;;  %s594_s10 = sphi %s628_s10, %s849_s10   ;;  %s590_s9 = sphi %s626_s9, %s848_s9   ;;  %s586_s8 = sphi %s624_s8, %s847_s8   ;;  %s582_s7 = sphi %s622_s7, %s846_s7   ;;  %s578_s6 = sphi %s620_s6, %s845_s6  }
   0x6   : > { %s24_s14 = sadd.s32 1, %s594_s10  ;;  %s62_s15 = sadd.s32 1, %s586_s8 }
   0x7   : > { %p25_p0 = scmp.ge.s32.totalorder %s24_s14, 4  ;;  %p72_p1 = scmp.ne.s32.totalorder %s586_s8, %s582_s7 }
   0x8   : > { %p73_p2 = scmp.eq.s32.totalorder %s378_s12, 3  ;;  %p78_p3 = scmp.ne.s32.totalorder %s582_s7, %s578_s6 }
   0x9   : > { %s851_s14 = smov (%p25_p0, %s24_s14), 0  ;;  %p79_p5 = scmp.eq.s32.totalorder %s379_s13, 3 }
   0xa   : > { %p660_p4 = por %p73_p2, %p72_p1  ;;  %s58_s17 = ssub.s32 %s594_s10, %s851_s14 }
   0xb   : > { %p380_p6 = scmp.ge.s32.totalorder %s598_s11, 1  ;;  %p60_p7 = scmp.eq.s32.totalorder %s58_s17, 0 }
   0xc   : > { %s836_s16 = scalar_select %p660_p4, 1, 0 }
   0xd   : > { %p667_p8 = por %p79_p5, %p78_p3  ;;  %p86_p9 = scmp.lt.s32.totalorder %s598_s11, 5 }
   0xe   : > { %s673_s19 = scalar_select %p60_p7, %s586_s8, %s62_s15  }
   0xf   : > { %s837_s18 = scalar_select %p667_p8, 1, 0 }
  0x10   : > { %p675_p10 = pnand %p380_p6, %p86_p9  ;;  %p679_p11 = scmp.eq.s32.totalorder %s378_s12, 0 }
  0x11   : > { %s600_s22 = smov [#allocation3]   ;;  %s488_s27 = scalar_lea.hbm %s830_s0, 256 }
  0x12   : > { %s838_s20 = scalar_select %p675_p10, 1, 0 }
  0x13   : > { %s839_s21 = scalar_select %p679_p11, 1, 0 }
  0x14   : > { %p396_p12 = pneg %p675_p10  ;;  %s101_s23 = sshll.u32 %s600_s22, 4  ;;  %s102_s23 = int_to_ptr.vmem [resolvable:$true] %s101_s23 }
  0x15   : > { %p489_p0 = scmp.ne.s32.totalorder %s830_s0, %s488_s27  ;;  %p495_p5 = scmp.lt.u32.totalorder %s488_s27, %s830_s0 }
  0x16   : > { %p687_p13 = pnand %p679_p11, %p396_p12 }
  0x18   : > { %p490_p1 = pneg %p687_p13 }
  0x1a   : > { %p491_p2 = pnand %p490_p1, %p489_p0 }
  0x1c   : > { %p492_p3 = pneg %p491_p2 }
  0x1e   : > { %p497_p6 = pnand %p495_p5, %p492_p3 }
  0x20   : > { %500 = shalt.err (!%p497_p6)
}
  0x21   : > { %s501_s3 = scalar_lea.vmem %s102_s23, 256  ;;  %p509_p8 = scmp.lt.s32.totalorder %s102_s23, %s102_s23 }
  0x22   : > { %p502_p7 = scmp.ne.s32.totalorder %s102_s23, %s501_s3  ;;  %p510_p4 = scmp.lt.s32.totalorder %s501_s3, %s501_s3 }
  0x24   : > { %p504_p9 = pnand %p502_p7, %p490_p1  ;;  %p511_p11 = por %p510_p4, %p509_p8 }
  0x26   : > { %p505_p12 = pneg %p504_p9 }
  0x28   : > { %p512_p10 = pnand %p511_p11, %p505_p12 }
  0x2a   : > { %515 = shalt.err (!%p512_p10)
}
  0x2b   : > { %s601_s4 = smov 128   ;;  %s602_s5 = smov 8  }
  0x2c   : > { %399 = dma.hbm_to_vmem [thread:$0]  (!%p687_p13), %s830_s0, 256, %s102_s23, [#allocation4], %s601_s4, %s601_s4, %s602_s5  }
  0x2d   : > { %p841_p0 = scmp.ne.s32.totalorder %s838_s20, 0 }
  0x2e   : > { %p842_p2 = scmp.ne.s32.totalorder (!%p841_p0), %s839_s21, 0 }
  0x2f   : > { %117 = sbr.rel (%p841_p0) target bundleno = 332 (0x14c), region = 24 }
  0x36   : > { %569 = dma.done.wait (%p842_p2), [#allocation4], 256  }
  0x37   : > { %571 = vsyncadd (%p842_p2), [#allocation4], 4294967040  ;;  %s129_s15 = sand.u32 1, %s582_s7   ;;  %p384_p4 = scmp.ne.s32.totalorder %s590_s9, 0 }
  0x38   : > { %s389_s17 = smul.u32 416, %s129_s15  ;;  %v139_v0 = vld [vmem:[#allocation3] sm:$0xff] (!%p384_p4)  ;;  %v140_v1 = vld [vmem:[#allocation3 + $0x8] sm:$0xff] (!%p384_p4)  ;;  %s603_s20 = smov (!%p384_p4), 64   ;;  %vm221_vm0 = vcmask (!%p384_p4), 261120   ;;  %vm224_vm1 = vcmask (!%p384_p4), 523264  }
  0x39   : > { %138 = sbr.rel (%p384_p4) target bundleno = 284 (0x11c), region = 32  ;;  %v143_v2 = vmul.f32 (!%p384_p4), 0.70710677, %v139_v0  ;;  %v144_v3 = vmul.f32 (!%p384_p4), 0.70710677, %v140_v1  ;;  %v141_v4 = vmul.f32 (!%p384_p4), 0.5, %v139_v0 }
  0x3a   : > { %s716_s22 = scalar_lea.vmem [#allocation6], %s389_s17  ;;  %v142_v6 = vmul.f32 (!%p384_p4), 0.5, %v140_v1  ;;  %s604_s21 = smov (!%p384_p4), 32   ;;  %vm227_vm2 = vcmask (!%p384_p4), 785408  }
  0x3b   : > { %464 = verf.f32 (!%p384_p4), %v143_v2  ;;  %s605_s23 = smov (!%p384_p4), 96  }
  0x3c   : > { %466 = verf.f32 (!%p384_p4), %v144_v3 }
  0x45   : > { %v465_v5 = vpop.eup %464 }
  0x46   : > { %v467_v7 = vpop.eup %466  ;;  %v147_v8 = vadd.f32 1.0, %v465_v5 }
  0x47   : > { %v148_v9 = vadd.f32 1.0, %v467_v7 }
  0x48   : > { %v149_v10 = vmul.f32 %v147_v8, %v141_v4 }
  0x49   : > { %v150_v11 = vmul.f32 %v148_v9, %v142_v6 }
  0x4a   : > { %v153_v12 = vmul.f32 0.70710677, %v149_v10  ;;  %v151_v14 = vmul.f32 0.5, %v149_v10 }
  0x4b   : > { %v154_v13 = vmul.f32 0.70710677, %v150_v11  ;;  %v152_v16 = vmul.f32 0.5, %v150_v11 }
  0x4c   : > { %468 = verf.f32 %v153_v12 }
  0x4d   : > { %470 = verf.f32 %v154_v13 }
  0x56   : > { %v469_v15 = vpop.eup %468 }
  0x57   : > { %v471_v17 = vpop.eup %470  ;;  %v157_v18 = vadd.f32 1.0, %v469_v15 }
  0x58   : > { %v158_v19 = vadd.f32 1.0, %v471_v17 }
  0x59   : > { %v159_v20 = vmul.f32 %v157_v18, %v151_v14 }
  0x5a   : > { %v160_v21 = vmul.f32 %v158_v19, %v152_v16 }
  0x5b   : > { %v163_v22 = vmul.f32 0.70710677, %v159_v20  ;;  %v161_v24 = vmul.f32 0.5, %v159_v20 }
  0x5c   : > { %v164_v23 = vmul.f32 0.70710677, %v160_v21  ;;  %v162_v26 = vmul.f32 0.5, %v160_v21 }
  0x5d   : > { %472 = verf.f32 %v163_v22 }
  0x5e   : > { %474 = verf.f32 %v164_v23 }
  0x67   : > { %v473_v25 = vpop.eup %472 }
  0x68   : > { %v475_v27 = vpop.eup %474  ;;  %v167_v28 = vadd.f32 1.0, %v473_v25 }
  0x69   : > { %v168_v29 = vadd.f32 1.0, %v475_v27 }
  0x6a   : > { %v169_v30 = vmul.f32 %v167_v28, %v161_v24 }
  0x6b   : > { %v170_v31 = vmul.f32 %v168_v29, %v162_v26 }
  0x6c   : > { %v173_v32 = vmul.f32 0.70710677, %v169_v30  ;;  %v171_v34 = vmul.f32 0.5, %v169_v30 }
  0x6d   : > { %v174_v33 = vmul.f32 0.70710677, %v170_v31  ;;  %v172_v36 = vmul.f32 0.5, %v170_v31 }
  0x6e   : > { %476 = verf.f32 %v173_v32 }
  0x6f   : > { %478 = verf.f32 %v174_v33 }
  0x78   : > { %v477_v35 = vpop.eup %476 }
  0x79   : > { %v479_v37 = vpop.eup %478  ;;  %v177_v38 = vadd.f32 1.0, %v477_v35 }
  0x7a   : > { %v178_v39 = vadd.f32 1.0, %v479_v37 }
  0x7b   : > { %v179_v40 = vmul.f32 %v177_v38, %v171_v34 }
  0x7c   : > { %v180_v41 = vmul.f32 %v178_v39, %v172_v36 }
  0x7d   : > { %v183_v42 = vmul.f32 0.70710677, %v179_v40  ;;  %v181_v44 = vmul.f32 0.5, %v179_v40 }
  0x7e   : > { %v184_v43 = vmul.f32 0.70710677, %v180_v41  ;;  %v182_v46 = vmul.f32 0.5, %v180_v41 }
  0x7f   : > { %480 = verf.f32 %v183_v42 }
  0x80   : > { %482 = verf.f32 %v184_v43 }
  0x89   : > { %v481_v45 = vpop.eup %480 }
  0x8a   : > { %v483_v47 = vpop.eup %482  ;;  %v187_v48 = vadd.f32 1.0, %v481_v45 }
  0x8b   : > { %v188_v49 = vadd.f32 1.0, %v483_v47 }
  0x8c   : > { %v189_v50 = vmul.f32 %v187_v48, %v181_v44 }
  0x8d   : > { %v190_v51 = vmul.f32 %v188_v49, %v182_v46 }
  0x8e   : > { %v193_v52 = vmul.f32 0.70710677, %v189_v50  ;;  %v191_v54 = vmul.f32 0.5, %v189_v50 }
  0x8f   : > { %v194_v53 = vmul.f32 0.70710677, %v190_v51  ;;  %v192_v58 = vmul.f32 0.5, %v190_v51 }
  0x90   : > { %484 = verf.f32 %v193_v52 }
  0x91   : > { %486 = verf.f32 %v194_v53 }
  0x9a   : > { %v485_v55 = vpop.eup %484 }
  0x9b   : > { %v487_v56 = vpop.eup %486  ;;  %v197_v57 = vadd.f32 1.0, %v485_v55 }
  0x9c   : > { %v198_v59 = vadd.f32 1.0, %v487_v56 }
  0x9d   : > { %v199_v60 = vmul.f32 %v197_v57, %v191_v54 }
  0x9e   : > { %v200_v61 = vmul.f32 %v198_v59, %v192_v58 }
  0x9f   : > { %209 = vrot.lane.b32.xlu1 %v199_v60, %s603_s20  ;;  %203 = vrot.lane.b32.xlu0 %v199_v60, %s604_s21 }
  0xa3   : > { %211 = vrot.lane.b32.xlu1 %v200_v61, %s603_s20  ;;  %205 = vrot.lane.b32.xlu0 %v200_v61, %s604_s21 }
  0xa7   : > { %217 = vrot.lane.b32.xlu1 %v200_v61, %s605_s23  ;;  %215 = vrot.lane.b32.xlu0 %v199_v60, %s605_s23 }
 0x111   : > { %v210_v62 = vpop.permute.xlu1 %209  ;;  %v204_v63 = vpop.permute.xlu0 %203 }
 0x112   : > { %v222_v2 = vsel %vm221_vm0, %v199_v60, %v204_v63 }
 0x113   : > { %v225_v6 = vsel %vm224_vm1, %v222_v2, %v210_v62 }
 0x115   : > { %v212_v0 = vpop.permute.xlu1 %211  ;;  %v206_v1 = vpop.permute.xlu0 %205 }
 0x116   : > { %v223_v3 = vsel %vm221_vm0, %v200_v61, %v206_v1 }
 0x117   : > { %v226_v5 = vsel %vm224_vm1, %v223_v3, %v212_v0 }
 0x119   : > { %v218_v4 = vpop.permute.xlu1 %217  ;;  %v216_v7 = vpop.permute.xlu0 %215 }
 0x11a   : > { %v229_v8 = vsel %vm227_vm2, %v226_v5, %v218_v4  ;;  %v228_v9 = vsel %vm227_vm2, %v225_v6, %v216_v7 }
 0x11b   : > { %231 = vst [vmem:[#allocation2 + $0x8] sm:$0xff] %v229_v8  ;;  %230 = vst [vmem:[#allocation2] sm:$0xff] %v228_v9 }
 0x11c PF: > { %s388_s24 = smul.u32 3328, %s590_s9  ;;  %s303_s25 = sshll.u32 %s716_s22, 4  ;;  %s780_s25 = int_to_ptr.vmem [resolvable:$true] %s303_s25 }
 0x11d   : > { %s784_s29 = scalar_lea.sflag [#allocation5], %s129_s15  ;;  %s516_s30 = scalar_lea.vmem %s780_s25, 6656 }
 0x11e   : > { %s778_s28 = scalar_lea.hbm %s831_s1, %s388_s24  ;;  %p517_p8 = scmp.ne.s32.totalorder %s780_s25, %s516_s30 }
 0x11f   : > { %p843_p10 = scmp.ne.s32.totalorder %s836_s16, 0  ;;  %s606_s2 = smov [#allocation6]  }
 0x120   : > { %s520_s9 = sshll.u32 %s606_s2, 4  ;;  %s521_s9 = int_to_ptr.vmem [resolvable:$false] %s520_s9 }
 0x121   : > { %p518_p11 = pnand %p517_p8, %p843_p10  ;;  %s522_s3 = scalar_lea.vmem %s521_s9, 13312 }
 0x122   : > { %v232_v10 = vld [vmem:[#allocation2] sm:$0xff]  ;;  %v233_v11 = vld [vmem:[#allocation2 + $0x8] sm:$0xff]  ;;  %p523_p1 = scmp.lt.s32.totalorder %s780_s25, %s521_s9  ;;  %p524_p3 = scmp.lt.s32.totalorder %s522_s3, %s516_s30 }
 0x123   : > { %234 = vst [vmem:[%s716_s22] sm:$0xff] %v232_v10  ;;  %236 = vst [vmem:[%s716_s22 + $0x8] sm:$0xff] %v232_v10  ;;  %p519_p13 = pneg %p518_p11 }
 0x124   : > { %238 = vst [vmem:[%s716_s22 + $0x10] sm:$0xff] %v232_v10  ;;  %240 = vst [vmem:[%s716_s22 + $0x18] sm:$0xff] %v232_v10  ;;  %p525_p5 = por %p524_p3, %p523_p1 }
 0x125   : > { %242 = vst [vmem:[%s716_s22 + $0x20] sm:$0xff] %v232_v10  ;;  %244 = vst [vmem:[%s716_s22 + $0x28] sm:$0xff] %v232_v10 }
 0x126   : > { %246 = vst [vmem:[%s716_s22 + $0x30] sm:$0xff] %v232_v10  ;;  %248 = vst [vmem:[%s716_s22 + $0x38] sm:$0xff] %v232_v10  ;;  %p526_p6 = pnand %p525_p5, %p519_p13 }
 0x127   : > { %250 = vst [vmem:[%s716_s22 + $0x40] sm:$0xff] %v232_v10  ;;  %252 = vst [vmem:[%s716_s22 + $0x48] sm:$0xff] %v232_v10 }
 0x128   : > { %254 = vst [vmem:[%s716_s22 + $0x50] sm:$0xff] %v232_v10  ;;  %256 = vst [vmem:[%s716_s22 + $0x58] sm:$0xff] %v232_v10 }
 0x129   : > { %258 = vst [vmem:[%s716_s22 + $0x60] sm:$0xff] %v232_v10  ;;  %260 = vst [vmem:[%s716_s22 + $0x68] sm:$0xff] %v232_v10 }
 0x12a   : > { %262 = vst [vmem:[%s716_s22 + $0x70] sm:$0xff] %v232_v10  ;;  %264 = vst [vmem:[%s716_s22 + $0x78] sm:$0xff] %v232_v10 }
 0x12b   : > { %266 = vst [vmem:[%s716_s22 + $0x80] sm:$0xff] %v232_v10  ;;  %268 = vst [vmem:[%s716_s22 + $0x88] sm:$0xff] %v232_v10 }
 0x12c   : > { %270 = vst [vmem:[%s716_s22 + $0x90] sm:$0xff] %v232_v10  ;;  %272 = vst [vmem:[%s716_s22 + $0x98] sm:$0xff] %v232_v10 }
 0x12d   : > { %274 = vst [vmem:[%s716_s22 + $0xa0] sm:$0xff] %v232_v10  ;;  %276 = vst [vmem:[%s716_s22 + $0xa8] sm:$0xff] %v232_v10 }
 0x12e   : > { %278 = vst [vmem:[%s716_s22 + $0xb0] sm:$0xff] %v232_v10  ;;  %280 = vst [vmem:[%s716_s22 + $0xb8] sm:$0xff] %v232_v10 }
 0x12f   : > { %282 = vst [vmem:[%s716_s22 + $0xc0] sm:$0xff] %v232_v10  ;;  %284 = vst [vmem:[%s716_s22 + $0xc8] sm:$0xff] %v232_v10 }
 0x130   : > { %235 = vst [vmem:[%s716_s22 + $0xd0] sm:$0xff] %v233_v11  ;;  %237 = vst [vmem:[%s716_s22 + $0xd8] sm:$0xff] %v233_v11 }
 0x131   : > { %239 = vst [vmem:[%s716_s22 + $0xe0] sm:$0xff] %v233_v11  ;;  %241 = vst [vmem:[%s716_s22 + $0xe8] sm:$0xff] %v233_v11 }
 0x132   : > { %243 = vst [vmem:[%s716_s22 + $0xf0] sm:$0xff] %v233_v11  ;;  %245 = vst [vmem:[%s716_s22 + $0xf8] sm:$0xff] %v233_v11 }
 0x133   : > { %247 = vst [vmem:[%s716_s22 + $0x100] sm:$0xff] %v233_v11  ;;  %249 = vst [vmem:[%s716_s22 + $0x108] sm:$0xff] %v233_v11 }
 0x134   : > { %251 = vst [vmem:[%s716_s22 + $0x110] sm:$0xff] %v233_v11  ;;  %253 = vst [vmem:[%s716_s22 + $0x118] sm:$0xff] %v233_v11 }
 0x135   : > { %255 = vst [vmem:[%s716_s22 + $0x120] sm:$0xff] %v233_v11  ;;  %257 = vst [vmem:[%s716_s22 + $0x128] sm:$0xff] %v233_v11 }
 0x136   : > { %259 = vst [vmem:[%s716_s22 + $0x130] sm:$0xff] %v233_v11  ;;  %261 = vst [vmem:[%s716_s22 + $0x138] sm:$0xff] %v233_v11 }
 0x137   : > { %263 = vst [vmem:[%s716_s22 + $0x140] sm:$0xff] %v233_v11  ;;  %265 = vst [vmem:[%s716_s22 + $0x148] sm:$0xff] %v233_v11 }
 0x138   : > { %267 = vst [vmem:[%s716_s22 + $0x150] sm:$0xff] %v233_v11  ;;  %269 = vst [vmem:[%s716_s22 + $0x158] sm:$0xff] %v233_v11 }
 0x139   : > { %271 = vst [vmem:[%s716_s22 + $0x160] sm:$0xff] %v233_v11  ;;  %273 = vst [vmem:[%s716_s22 + $0x168] sm:$0xff] %v233_v11 }
 0x13a   : > { %275 = vst [vmem:[%s716_s22 + $0x170] sm:$0xff] %v233_v11  ;;  %277 = vst [vmem:[%s716_s22 + $0x178] sm:$0xff] %v233_v11 }
 0x13b   : > { %279 = vst [vmem:[%s716_s22 + $0x180] sm:$0xff] %v233_v11  ;;  %281 = vst [vmem:[%s716_s22 + $0x188] sm:$0xff] %v233_v11 }
 0x13c   : > { %283 = vst [vmem:[%s716_s22 + $0x190] sm:$0xff] %v233_v11  ;;  %285 = vst [vmem:[%s716_s22 + $0x198] sm:$0xff] %v233_v11 }
 0x13d   : > { %529 = shalt.err (!%p526_p6)
}
 0x13e   : > { %s530_s4 = scalar_lea.hbm %s778_s28, 6656  ;;  %s534_s13 = scalar_lea.hbm %s831_s1, 26624 }
 0x13f   : > { %p531_p7 = scmp.ne.s32.totalorder %s778_s28, %s530_s4  ;;  %p535_p0 = scmp.lt.u32.totalorder %s778_s28, %s831_s1 }
 0x140   : > { %p536_p2 = scmp.lt.u32.totalorder %s534_s13, %s530_s4  ;;  %p538_p8 = scmp.lt.u32.totalorder %s530_s4, %s778_s28 }
 0x141   : > { %p532_p9 = pnand %p531_p7, %p843_p10 }
 0x142   : > { %p537_p4 = por %p536_p2, %p535_p0 }
 0x143   : > { %p533_p12 = pneg %p532_p9 }
 0x144   : > { %p539_p11 = por %p538_p8, %p537_p4 }
 0x146   : > { %p540_p13 = pnand %p539_p11, %p533_p12 }
 0x148   : > { %543 = shalt.err (!%p540_p13)
}
 0x149   : > { %s607_s22 = smov 3328   ;;  %s608_s20 = smov 13312  }
 0x14a   : > { %s609_s21 = smov 208  }
 0x14b   : > { %394 = dma.vmem_to_hbm [thread:$0]  (%p843_p10), %s780_s25, 6656, %s778_s28, %s784_s29, %s607_s22, %s608_s20, %s609_s21  }
 0x14c PF: > { %p406_p1 = scmp.ge.s32.totalorder %s598_s11, 2  ;;  %s318_s23 = sand.u32 1, %s578_s6  }
 0x14d   : > { %p844_p3 = scmp.ne.s32.totalorder %s837_s18, 0  ;;  %s319_s24 = scalar_lea.sflag [#allocation5], %s318_s23 }
 0x14f   : > { %p401_p5 = pnand %p406_p1, %p844_p3 }
 0x151   : > { %573 = dma.done.wait (!%p401_p5), %s319_s24, 6656  }
 0x152   : > { %575 = vsyncadd (!%p401_p5), %s319_s24, 4294960640  ;;  %s15_s11 = sadd.s32 1, %s598_s11   ;;  %s845_s6 = smov %s582_s7 }
 0x153   : > { %p12_p6 = scmp.ge.s32.totalorder %s15_s11, 6   ;;  %s846_s7 = smov %s586_s8 }
 0x154   : > { %s847_s8 = smov %s673_s19  ;;  %s848_s9 = smov %s594_s10 }
 0x155   : > { %s849_s10 = smov %s851_s14  ;;  %14 = sbr.rel (!%p12_p6) target bundleno = 5 (0x5), region = 66 }
 0x15c   :  { %324 = vsyncpa [#allocation4], 1 }
 0x15d   :  { %326 = vsyncpa [#allocation4 + $0x1], 1 }
 0x15e   :  { %327 = vsyncpa [#allocation5], 1 }
 0x15f   :  { %329 = vsyncpa [#allocation5 + $0x1], 1 }

</bundles_post_ra>
